<compile_context>
chip_gen: v7x
topology: tpu7x:2x2x1
jax: 0.10.0
libtpu: 0.0.40
codegen_flags: <defaults>
</compile_context>

<pallas_src>
from functools import partial

import jax
import jax.numpy as jnp
from jax import lax
from jax.experimental import pallas as pl
from jax.experimental.pallas import tpu as pltpu

# ---- cfg.* equivalents (fixed in-script, no external config) ---------------
REDUCE_BORDER_EPOCH = -1     # border-reduce / OHEM branch never taken
BATCH_WEIGHTING = False      # per-image class weights
UPPER_BOUND = 1.0
NORM = False
IGNORE_INDEX = 255           # unused in this (non-OHEM) path


# --------------------------- stats kernel ------------------------------------
def _stats_kernel(tgt_ref, out_ref, *, num_classes, n_valid, tile_n, ragged):
    """One read of target.  Per (tile, image): per-channel pixel sums (all C+1
    channels, for the histogram) and the count of ignored pixels (class-channel
    sum == 0).  Written as a lane-dense (C+2, 128) block; JAX sums the tiles."""
    C = num_classes
    t_all = tgt_ref[0].astype(jnp.float32)                       # (C+1, T)
    if ragged:
        lane = lax.broadcasted_iota(jnp.int32, (1, tile_n), 1)
        valid = (lane + pl.program_id(0) * tile_n) < n_valid      # (1, T)
        t_all = jnp.where(valid, t_all, 0.0)

    ch = jnp.sum(t_all, axis=1, keepdims=True)                    # (C+1, 1)
    w = jnp.sum(t_all[:C], axis=0, keepdims=True)                 # (1, T)
    ign = (w == 0.0).astype(jnp.float32)                          # (1, T)
    if ragged:
        ign = jnp.where(valid, ign, 0.0)
    cnt = jnp.sum(ign, axis=1, keepdims=True)                     # (1, 1)

    out_ref[0, 0, 0:C + 1, :] = jnp.broadcast_to(ch, (C + 1, 128))
    out_ref[0, 0, C + 1:C + 2, :] = jnp.broadcast_to(cnt, (1, 128))


# --------------------------- main loss kernel --------------------------------
def _loss_kernel(logits_ref, tgt_ref, cwd_ref, out_ref, a_acc, inv_acc, *,
                 num_classes, n_valid, tile_n, ragged, assume_binary_targets):
    """Grid = (spatial_tile, image).  For a fixed tile, loop over images
    (inner, 'arbitrary' axis) accumulating:
       a_acc(pix)   += -sum_c tgt*cw_i/denom_i * csoft        (0 at ignored pix)
       inv_acc(pix) += 1 / max(sum_c tgt_i(pix), 1)           (== 1/border_weights)
    On the last image, write sum_pix a_acc*inv_acc into this tile's output."""
    C = num_classes
    b = pl.program_id(1)
    nb = pl.num_programs(1)

    @pl.when(b == 0)
    def _():
        a_acc[...] = jnp.zeros_like(a_acc)
        inv_acc[...] = jnp.zeros_like(inv_acc)

    logits = logits_ref[0].astype(jnp.float32)                   # (C, T)
    tgt = tgt_ref[0].astype(jnp.float32)[:C, :]                  # drop border ch
    cwd = cwd_ref[b]                                             # (C, 1) f32

    if ragged:
        # Only the last tile can overhang; the overhang lanes contain garbage
        # (possibly NaN), so select — not multiply — them to benign values.
        lane = lax.broadcasted_iota(jnp.int32, (1, tile_n), 1)
        valid = (lane + pl.program_id(0) * tile_n) < n_valid      # (1, T)
        logits = jnp.where(valid, logits, 0.0)
        tgt = jnp.where(valid, tgt, 0.0)

    # log-sum-exp form: no p = e/z divide, no (C,T) log of probabilities.
    m = jnp.max(logits, axis=0, keepdims=True)                   # (1, T)
    shifted = logits - m
    e = jnp.exp(shifted)                                         # (C, T)  C*T exp
    z = jnp.sum(e, axis=0, keepdims=True)                        # (1, T)
    log_z = jnp.log(z)                                           # (1, T)
    s_e = jnp.sum(e * tgt, axis=0, keepdims=True)                # == z*sum_c p*tgt

    tcw = tgt * cwd                                              # (C, T)
    tw = jnp.sum(tcw, axis=0, keepdims=True)                     # (1, T)

    if assume_binary_targets:
        # tgt * log(max(p, tgt*sum(p*tgt))) == tgt * (max(shifted, log s_e) - log z)
        # exact for {0,1} multi-hot relax targets; no select needed because
        # tcw == 0 wherever tgt == 0 (and max(shifted, -inf) stays finite).
        dot_term = jnp.sum(tcw * jnp.maximum(shifted, jnp.log(s_e)),
                           axis=0, keepdims=True)
    else:
        # exact for arbitrary soft targets (C*T logs; tiny clamp avoids log(0)).
        unnorm = jnp.log(jnp.maximum(jnp.maximum(e, tgt * s_e),
                                     jnp.float32(1e-30)))
        dot_term = jnp.sum(tcw * unnorm, axis=0, keepdims=True)

    w = jnp.sum(tgt, axis=0, keepdims=True)                      # (1, T) border w
    wsafe = jnp.where(w == 0.0, 1.0, w)

    # Ignored / masked-off pixels contribute exactly 0 (tw == dot_term == 0),
    # so no `keep` factor is needed; inv_acc stays finite there and is inert.
    a_acc[...] += log_z * tw - dot_term
    inv_acc[...] += pl.reciprocal(wsafe, approx=True)

    @pl.when(b == nb - 1)
    def _():
        partial_sum = jnp.sum(a_acc[...] * inv_acc[...])
        # lane-dense (8,128) write, once per tile; wrapper picks [0, t*128].
        out_ref[...] = jnp.zeros((8, 128), jnp.float32) + partial_sum


# --------------------------- wrapper ------------------------------------------
def _pick_tiles(N, per_lane_bytes, budget_bytes, max_tile_n=None):
    n_blocks = pl.cdiv(N, 128)
    cap_blocks = max(1, min((budget_bytes // max(per_lane_bytes, 1)) // 128, 512))
    if max_tile_n is not None:
        cap_blocks = min(cap_blocks, max(1, max_tile_n // 128))
    n_tiles = pl.cdiv(n_blocks, cap_blocks)
    if n_blocks >= 2:
        # keep >=2 (even-biased) tiles so both v7x TensorCores get work on the
        # "parallel" axis; costs only a few extra grid steps on 1-TC chips.
        n_tiles = max(n_tiles, 2)
        if n_tiles % 2:
            n_tiles += 1
        n_tiles = min(n_tiles, n_blocks)
    tile_blocks = pl.cdiv(n_blocks, n_tiles)
    tile_n = tile_blocks * 128
    n_tiles = pl.cdiv(n_blocks, tile_blocks)
    return tile_n, n_tiles


def img_wt_loss_soft_nll(logits, target, *, upper_bound=UPPER_BOUND,
                         max_tile_n=None, assume_binary_targets=True,
                         vmem_budget_bytes=None):
    """logits: (B, C, H, W) float (f32/bf16); target: (B, C+1, H, W) multi-hot
    (+ border channel), float or int8/uint8.  Returns scalar f32 loss.

    NOTE: assume_binary_targets=True is exact only for {0,1} multi-hot relax
    targets; pass False for genuinely soft targets."""
    B, C, H, W = logits.shape
    assert target.shape == (B, C + 1, H, W)
    N = H * W
    f32 = jnp.float32

    # contiguous reshapes only — no pads, no slices, no dtype copies in HBM.
    logits_r = logits.reshape(B, C, N)
    target_r = target.reshape(B, C + 1, N)

    # ---- generation-aware VMEM sizing ---------------------------------------
    try:
        vmem_cap = int(pltpu.get_tpu_info().vmem_capacity_bytes)
    except Exception:
        vmem_cap = 64 << 20                      # v7x-safe fallback
    if vmem_budget_bytes is None:
        vmem_budget_bytes = min(int(vmem_cap * 0.42), 56 << 20)
    vmem_limit = int(min(int(vmem_cap * 0.85), 96 << 20))

    li = jnp.dtype(logits.dtype).itemsize
    ti = jnp.dtype(target.dtype).itemsize
    # double-buffered input tiles + ~6 (C, T) f32 temporaries + scratch rows.
    per_lane = 2 * C * li + 2 * (C + 1) * ti + 6 * C * 4 + 128
    TILE_N, n_tiles = _pick_tiles(N, per_lane, vmem_budget_bytes, max_tile_n)
    ragged = (n_tiles * TILE_N != N)

    # ---- pass 1: per-image stats (single read of target) --------------------
    stats = pl.pallas_call(
        partial(_stats_kernel, num_classes=C, n_valid=N, tile_n=TILE_N,
                ragged=ragged),
        out_shape=jax.ShapeDtypeStruct((B, n_tiles, C + 2, 128), f32),
        grid_spec=pltpu.PrefetchScalarGridSpec(
            num_scalar_prefetch=0,
            grid=(n_tiles, B),
            in_specs=[pl.BlockSpec((1, C + 1, TILE_N), lambda t, b: (b, 0, t))],
            out_specs=pl.BlockSpec((1, 1, C + 2, 128),
                                   lambda t, b: (b, t, 0, 0)),
        ),
        compiler_params=pltpu.CompilerParams(
            dimension_semantics=("parallel", "parallel"),
            vmem_limit_bytes=vmem_limit,
        ),
    )(target_r)

    st = stats[:, :, :, 0].sum(axis=1)                      # (B, C+2), tiny
    ch_sum = st[:, :C + 1]
    ign_cnt = st[:, C + 1]
    total = ch_sum.sum(axis=1, keepdims=True)
    hist = ch_sum / total
    cw = (hist != 0).astype(f32) * upper_bound * (1.0 - hist) + 1.0
    cw = cw[:, :C]                                           # (B, C)
    denom = jnp.float32(N) - ign_cnt + 1.0                   # 1*H*W - mask + 1
    cwd = (cw / denom[:, None])[:, :, None].astype(f32)      # (B, C, 1)

    # ---- pass 2: the loss kernel --------------------------------------------
    out = pl.pallas_call(
        partial(_loss_kernel, num_classes=C, n_valid=N, tile_n=TILE_N,
                ragged=ragged, assume_binary_targets=assume_binary_targets),
        out_shape=jax.ShapeDtypeStruct((8, n_tiles * 128), f32),
        grid_spec=pltpu.PrefetchScalarGridSpec(
            num_scalar_prefetch=0,
            grid=(n_tiles, B),                 # batch is the reduction axis
            in_specs=[
                pl.BlockSpec((1, C, TILE_N), lambda t, b: (b, 0, t)),
                pl.BlockSpec((1, C + 1, TILE_N), lambda t, b: (b, 0, t)),
                # whole cwd resident once (constant block index), indexed by b
                pl.BlockSpec((B, C, 1), lambda t, b: (0, 0, 0)),
            ],
            out_specs=pl.BlockSpec((8, 128), lambda t, b: (0, t)),
            scratch_shapes=[pltpu.VMEM((1, TILE_N), f32),    # a_acc
                            pltpu.VMEM((1, TILE_N), f32)],   # inv_acc
        ),
        compiler_params=pltpu.CompilerParams(
            dimension_semantics=("parallel", "arbitrary"),
            vmem_limit_bytes=vmem_limit,
        ),
    )(logits_r, target_r, cwd)

    # one partial per spatial tile, replicated across its (8,128) block.
    return jnp.sum(out[0, 0::128])


# --------------------------- pure-JAX reference ------------------------------
def _reference_loss(logits, target, upper_bound=UPPER_BOUND):
    B, C, H, W = logits.shape
    tgt_cls = target[:, :C].astype(jnp.float32)               # (B,C,H,W)
    weights = tgt_cls.sum(1)                                  # (B,H,W)
    ignore_mask = weights == 0
    weights = jnp.where(ignore_mask, 1.0, weights)
    total = jnp.float32(0.0)
    for i in range(B):
        t = target[i].astype(jnp.float32)                     # (C+1,H,W)
        hist = t.sum(axis=(1, 2)) / t.sum()
        cw = ((hist != 0).astype(jnp.float32) * upper_bound * (1 - hist) + 1)[:C]
        p = jax.nn.softmax(logits[i].astype(jnp.float32), axis=0)
        m = tgt_cls[i]
        csoft = jnp.log(jnp.maximum(p, m * (p * m).sum(0, keepdims=True)))
        per = (m * cw[:, None, None] * csoft).sum(0)          # (H,W)
        keep = 1.0 - ignore_mask[i].astype(jnp.float32)
        loss_matrix = (-1.0 / weights) * per[None] * keep[None]   # (B,H,W)
        denom = 1 * H * W - ignore_mask[i].sum() + 1
        total = total + loss_matrix.sum() / denom
    return total


def _make_inputs(key, B, C, H, W):
    k1, k2, k3, k4, k5 = jax.random.split(key, 5)
    logits = jax.random.normal(k1, (B, C, H, W), dtype=jnp.float32)
    lab1 = jax.random.randint(k2, (B, H, W), 0, C)
    lab2 = jax.random.randint(k3, (B, H, W), 0, C)
    oh1 = jnp.transpose(jax.nn.one_hot(lab1, C, dtype=jnp.float32), (0, 3, 1, 2))
    oh2 = jnp.transpose(jax.nn.one_hot(lab2, C, dtype=jnp.float32), (0, 3, 1, 2))
    relax = (jax.random.uniform(k4, (B, 1, H, W)) < 0.2).astype(jnp.float32)
    multihot = jnp.maximum(oh1, oh2 * relax)        # relaxed (multi-hot) labels
    ignored = (jax.random.uniform(k5, (B, H, W)) < 0.1).astype(jnp.float32)
    cls_part = multihot * (1.0 - ignored)[:, None]
    border = ignored[:, None]                       # border / ignore channel
    target = jnp.concatenate([cls_part, border], axis=1)      # (B, C+1, H, W)
    return logits, target


if __name__ == "__main__":
    key = jax.random.PRNGKey(0)
    ka, kb = jax.random.split(key)

    # Tolerances: 5e-4 covers the worst-case table error of the EUP approx
    # reciprocal (weights are small positive integers, typically exact) plus
    # exp/log reassociation; the exact-divide variant matched at 1e-4.

    # config A: f32 inputs, non-multiple-of-8 channels, ragged spatial size,
    # forced 2 tiles (exercises the masked-tail path).
    logits, target = _make_inputs(ka, B=2, C=6, H=12, W=18)
    out = jax.block_until_ready(
        img_wt_loss_soft_nll(logits, target, max_tile_n=128))
    ref = jax.block_until_ready(_reference_loss(logits, target))
    assert jnp.allclose(out, ref, rtol=5e-4, atol=5e-4), (out, ref)

    # config B: cityscapes-like channel count, bf16 logits + int8 targets
    # (narrow-dtype DMA path), evenly tiled spatial size (no masked tail).
    logits2, target2 = _make_inputs(kb, B=2, C=19, H=32, W=32)
    logits2 = logits2.astype(jnp.bfloat16)
    target2 = target2.astype(jnp.int8)
    out2 = jax.block_until_ready(img_wt_loss_soft_nll(logits2, target2))
    ref2 = jax.block_until_ready(_reference_loss(logits2, target2))
    assert jnp.allclose(out2, ref2, rtol=5e-4, atol=5e-4), (out2, ref2)

    print("KERNEL_OK")
</pallas_src>

<mosaic_0001>
module attributes {stable_mosaic.version = 11 : i64} {
  func.func @_stats_kernel(%arg0: i32, %arg1: i32, %arg2: memref<1x7x128xf32, #tpu.memory_space<vmem>>, %arg3: memref<1x1x8x128xf32, #tpu.memory_space<vmem>>) attributes {dimension_semantics = [#tpu.dimension_semantics<parallel>, #tpu.dimension_semantics<parallel>], iteration_bounds = array<i64: 2, 2>, scalar_prefetch = 0 : i64, scratch_operands = 0 : i64, tpu.core_type = #tpu.core_type<tc>, window_params = [{transform_indices = @transform_0, window_bounds = array<i64: 1, 7, 128>}, {transform_indices = @transform_1, window_bounds = array<i64: 1, 1, 8, 128>}]} {
    %c0 = arith.constant 0 : index
    %c0_0 = arith.constant 0 : index
    %c0_1 = arith.constant 0 : index
    %0 = vector.load %arg2[%c0, %c0_0, %c0_1] : memref<1x7x128xf32, #tpu.memory_space<vmem>>, vector<1x7x128xf32>
    %1 = vector.shape_cast %0 : vector<1x7x128xf32> to vector<7x128xf32>
    %2 = tpu.iota {dimensions = array<i32: 1>} : vector<1x128xi32>
    %c128_i32 = arith.constant 128 : i32
    %3 = arith.muli %arg0, %c128_i32 : i32
    %4 = vector.broadcast %3 : i32 to vector<1x128xi32>
    %5 = arith.addi %2, %4 : vector<1x128xi32>
    %c216_i32 = arith.constant 216 : i32
    %6 = vector.broadcast %c216_i32 : i32 to vector<1x128xi32>
    %7 = arith.cmpi slt, %5, %6 : vector<1x128xi32>
    %cst = arith.constant 0.000000e+00 : f32
    %8 = vector.shape_cast %7 : vector<1x128xi1> to vector<1x128xi1>
    %9 = vector.broadcast %8 : vector<1x128xi1> to vector<7x128xi1>
    %10 = vector.broadcast %cst : f32 to vector<7x128xf32>
    %11 = arith.select %9, %1, %10 : vector<7x128xi1>, vector<7x128xf32>
    %cst_2 = arith.constant dense<0.000000e+00> : vector<7xf32>
    %12 = vector.multi_reduction <add>, %11, %cst_2 [1] : vector<7x128xf32> to vector<7xf32>
    %13 = vector.shape_cast %12 : vector<7xf32> to vector<7x1xf32>
    %14 = vector.extract_strided_slice %11 {offsets = [0, 0], sizes = [6, 128], strides = [1, 1]} : vector<7x128xf32> to vector<6x128xf32>
    %cst_3 = arith.constant dense<0.000000e+00> : vector<128xf32>
    %15 = vector.multi_reduction <add>, %14, %cst_3 [0] : vector<6x128xf32> to vector<128xf32>
    %16 = vector.shape_cast %15 : vector<128xf32> to vector<1x128xf32>
    %cst_4 = arith.constant 0.000000e+00 : f32
    %17 = vector.broadcast %cst_4 : f32 to vector<1x128xf32>
    %18 = arith.cmpf oeq, %16, %17 : vector<1x128xf32>
    %19 = arith.extui %18 : vector<1x128xi1> to vector<1x128xi32>
    %20 = arith.sitofp %19 : vector<1x128xi32> to vector<1x128xf32>
    %cst_5 = arith.constant 0.000000e+00 : f32
    %21 = vector.broadcast %cst_5 : f32 to vector<1x128xf32>
    %22 = arith.select %7, %20, %21 : vector<1x128xi1>, vector<1x128xf32>
    %cst_6 = arith.constant dense<0.000000e+00> : vector<1xf32>
    %23 = vector.multi_reduction <add>, %22, %cst_6 [1] : vector<1x128xf32> to vector<1xf32>
    %24 = vector.shape_cast %23 : vector<1xf32> to vector<1x1xf32>
    %25 = vector.shape_cast %13 : vector<7x1xf32> to vector<7x1xf32>
    %26 = vector.broadcast %25 : vector<7x1xf32> to vector<7x128xf32>
    %c0_7 = arith.constant 0 : index
    %c0_8 = arith.constant 0 : index
    %c0_9 = arith.constant 0 : index
    %c0_10 = arith.constant 0 : index
    %27 = vector.load %arg3[%c0_7, %c0_8, %c0_9, %c0_10] : memref<1x1x8x128xf32, #tpu.memory_space<vmem>>, vector<1x1x7x128xf32>
    %28 = vector.shape_cast %27 : vector<1x1x7x128xf32> to vector<7x128xf32>
    %29 = vector.shape_cast %26 : vector<7x128xf32> to vector<1x1x7x128xf32>
    tpu.vector_store %arg3[%c0_7, %c0_8, %c0_9, %c0_10], %29 {strides = array<i32>} : memref<1x1x8x128xf32, #tpu.memory_space<vmem>>, vector<1x1x7x128xf32>,
    %30 = vector.shape_cast %24 : vector<1x1xf32> to vector<1x1xf32>
    %31 = vector.broadcast %30 : vector<1x1xf32> to vector<1x128xf32>
    %c0_11 = arith.constant 0 : index
    %c0_12 = arith.constant 0 : index
    %c7 = arith.constant 7 : index
    %c0_13 = arith.constant 0 : index
    %32 = vector.load %arg3[%c0_11, %c0_12, %c7, %c0_13] : memref<1x1x8x128xf32, #tpu.memory_space<vmem>>, vector<1x1x1x128xf32>
    %33 = vector.shape_cast %32 : vector<1x1x1x128xf32> to vector<1x128xf32>
    %34 = vector.shape_cast %31 : vector<1x128xf32> to vector<1x1x1x128xf32>
    tpu.vector_store %arg3[%c0_11, %c0_12, %c7, %c0_13], %34 {strides = array<i32>} : memref<1x1x8x128xf32, #tpu.memory_space<vmem>>, vector<1x1x1x128xf32>,
    return
  }
  func.func @transform_0(%arg0: i32, %arg1: i32) -> (i32, i32, i32) {
    %c0_i32 = arith.constant 0 : i32
    %c0_i32_0 = arith.constant 0 : i32
    return %arg1, %c0_i32, %arg0 : i32, i32, i32
  }
  func.func @transform_1(%arg0: i32, %arg1: i32) -> (i32, i32, i32, i32) {
    %c0_i32 = arith.constant 0 : i32
    %c0_i32_0 = arith.constant 0 : i32
    %c0_i32_1 = arith.constant 0 : i32
    return %arg1, %arg0, %c0_i32, %c0_i32_0 : i32, i32, i32, i32
  }
}

</mosaic_0001>

<bundles_post_ra>
// kernel: tpu_custom_call.1
= control target key start
LH: loop header
LB: loop body
LE: loop exit
PB: predicated region body
PF: predicated region fallthrough
CT: control target
= control target key end

     0   :  { %6 = vsyncpa [#allocation3], 0  ;;  %s599_s0 = inlined_call_operand.vmem [shape: f32[2,7,216], index: 0, kind: input, shape index: {}]   ;;  %s600_s1 = inlined_call_operand.hbm [shape: f32[2,2,8,128], index: 1, kind: output, shape index: {}]  }
   0x1   :  { %8 = vsyncpa [#allocation3 + $0x1], 0  ;;  %s459_s6 = smov 0   ;;  %s461_s7 = smov 0  }
   0x2   :  { %s463_s8 = smov 0   ;;  %s465_s9 = smov 0  }
   0x3   :  { %s467_s10 = smov 0   ;;  %s469_s11 = smov 0  }
   0x4   :  { %s471_s12 = smov 0   ;;  %s473_s13 = smov 0  }
   0x5 LB: > { %s264_s14 = sadd.s32 4294967295, %s445_s13   ;;  %s265_s15 = sadd.s32 4294967294, %s445_s13   ;;  %s445_s13 = sphi %s473_s13, %s14_s13   ;;  %s441_s12 = sphi %s471_s12, %s609_s12   ;;  %s437_s11 = sphi %s469_s11, %s608_s11   ;;  %s433_s10 = sphi %s467_s10, %s607_s10   ;;  %s429_s9 = sphi %s465_s9, %s606_s9   ;;  %s425_s8 = sphi %s463_s8, %s605_s8   ;;  %s421_s7 = sphi %s461_s7, %s604_s7   ;;  %s417_s6 = sphi %s459_s6, %s603_s6  }
   0x6   : > { %s23_s16 = sadd.s32 1, %s437_s11  ;;  %s26_s17 = sadd.s32 1, %s441_s12 }
   0x7   : > { %p24_p0 = scmp.ge.s32.totalorder %s23_s16, 2  ;;  %p73_p1 = scmp.ne.s32.totalorder %s425_s8, %s421_s7 }
   0x8   : > { %p74_p2 = scmp.eq.s32.totalorder %s264_s14, 3  ;;  %p79_p5 = scmp.ne.s32.totalorder %s421_s7, %s417_s6 }
   0x9   : > { %s611_s16 = smov (%p24_p0, %s23_s16), 0  ;;  %s613_s17 = smov (!%p24_p0, %s26_s17), %s441_s12 }
   0xa   : > { %s58_s18 = ssub.s32 %s437_s11, %s611_s16  ;;  %p510_p3 = por %p74_p2, %p73_p1 }
   0xb   : > { %p28_p4 = scmp.ge.s32.totalorder %s613_s17, 2  ;;  %p80_p6 = scmp.eq.s32.totalorder %s265_s15, 3 }
   0xc   : > { %p268_p7 = scmp.ge.s32.totalorder %s445_s13, 1  ;;  %p109_p9 = scmp.lt.s32.totalorder %s445_s13, 5 }
   0xd   : > { %s615_s17 = smov (%p28_p4, %s613_s17), 0  ;;  %p519_p8 = por %p80_p6, %p79_p5 }
   0xe   : > { %s59_s21 = ssub.s32 %s441_s12, %s615_s17  ;;  %s63_s22 = sadd.s32 1, %s425_s8 }
   0xf   : > { %s60_s23 = sor.u32 %s59_s21, %s58_s18  ;;  %p110_p10 = pnand %p268_p7, %p109_p9 }
  0x10   : > { %p61_p11 = scmp.eq.s32.totalorder %s60_s23, 0  ;;  %p132_p12 = scmp.lt.s32.totalorder (!%p110_p10), %s429_s9, 1  ;;  %v141_v0 = vlaneseq (!%p110_p10)  ;;  %vm150_vm1 = vcmask (!%p110_p10), 1046528   ;;  %vm154_vm2 = vcmask (!%p110_p10), 1045504   ;;  %v447_v14 = vmov (!%p110_p10), 0.0  }
  0x11   : > { %113 = sbr.rel (%p110_p10) target bundleno = 204 (0xcc), region = 24  ;;  %p134_p13 = scmp.lt.s32.totalorder (!%p110_p10), %s433_s10, 1 }
  0x12   : > { %s528_s24 = scalar_select %p61_p11, %s425_s8, %s63_s22  }
  0x13   : > { %s272_s25 = sshll.u32 (!%p110_p10), %s433_s10, 7  ;;  %v142_v1 = vand.u32 (!%p110_p10), 127, %v141_v0  ;;  %s129_s5 = sand.u32 (!%p110_p10), 1, %s421_s7  }
  0x14   : > { %v144_v2 = vstv (!%p110_p10), %s272_s25  ;;  %s269_s14 = sshll.u32 (!%p110_p10), %s129_s5, 3  ;;  %s275_s18 = sshll.u32 (!%p110_p10), %s429_s9, 1 }
  0x15   : > { %v145_v3 = vadd.s32 (!%p110_p10), %v144_v2, %v142_v1  ;;  %s131_s15 = scalar_lea.vmem (!%p110_p10), [#allocation2], %s269_s14  ;;  %s182_s21 = sadd.s32 (!%p110_p10), %s433_s10, %s275_s18 }
  0x16   : > { %s186_s22 = sshll.u32 (!%p110_p10), %s131_s15, 4  ;;  %s276_s23 = sshll.u32 (!%p110_p10), %s182_s21, 7  ;;  %s543_s22 = int_to_ptr.vmem [resolvable:$true] %s186_s22 }
  0x17   : > { %vm146_vm0 = vcmp.lt.s32.totalorder (!%p110_p10), %v145_v3, 216 }
  0x18   : > { %s133_s26 = scalar_select %p132_p12, %s429_s9, 1 }
  0x19   : > { %s135_s27 = scalar_select %p134_p13, %s433_s10, 1 }
  0x1a   : > { %s270_s28 = sshll.u32 %s133_s26, 1  ;;  %s448_s9 = smov [#allocation2]  }
  0x1b   : > { %s137_s29 = sadd.s32 %s270_s28, %s135_s27  ;;  %s548_s27 = scalar_lea.hbm %s600_s1, %s276_s23 }
  0x1c   : > { %s271_s30 = sshll.u32 %s137_s29, 3  ;;  %s171_s28 = scalar_lea.sflag [#allocation3], %s129_s5 }
  0x1d   : > { %s139_s4 = scalar_lea.vmem %s599_s0, %s271_s30  ;;  %s351_s29 = scalar_lea.vmem %s543_s22, 128 }
  0x1e   : > { %v140_v4 = vld [vmem:[%s139_s4] sm:$0x7f]  ;;  %p352_p0 = scmp.ne.s32.totalorder %s543_s22, %s351_s29  ;;  %s355_s10 = sshll.u32 %s448_s9, 4  ;;  %s356_s10 = int_to_ptr.vmem [resolvable:$false] %s355_s10 }
  0x1f   : > { %v149_v5 = vsel %vm146_vm0, %v140_v4, 0.0  ;;  %s357_s30 = scalar_lea.vmem %s356_s10, 256  ;;  %p358_p4 = scmp.lt.s32.totalorder %s543_s22, %s356_s10 }
  0x20   : > { %v151_v6 = vsel %vm150_vm1, %v149_v5, 0.0  ;;  %v155_v7 = vsel %vm154_vm2, %v149_v5, 0.0  ;;  %p353_p1 = pnand %p352_p0, %p510_p3  ;;  %p359_p5 = scmp.lt.s32.totalorder %s357_s30, %s351_s29 }
  0x21   : > { %v156_v8 = vrot.slane %v155_v7, 4  ;;  %152 = vadd.xlane.f32.xlu0 %v151_v6 }
  0x22   : > { %p354_p2 = pneg %p353_p1  ;;  %p360_p6 = por %p359_p5, %p358_p4 }
  0x23   : > { %v157_v9 = vadd.f32 %v156_v8, %v155_v7 }
  0x24   : > { %p361_p7 = pnand %p360_p6, %p354_p2 }
  0x25   : > { %v158_v10 = vrot.slane %v157_v9, 2 }
  0x27   : > { %v159_v11 = vadd.f32 %v158_v10, %v157_v9 }
  0x29   : > { %v160_v12 = vrot.slane %v159_v11, 1 }
  0x2b   : > { %v161_v13 = vadd.f32 %v160_v12, %v159_v11 }
  0x2d   : > { %vm162_vm3 = vcmp.eq.f32.partialorder %v161_v13, 0.0 }
  0x2e   : > { %v273_v15 = vsel %vm162_vm3, 1.0, %v447_v14 }
  0x2f   : > { %v165_v16 = vsel %vm146_vm0, %v273_v15, 0.0 }
  0x30   : > { %166 = vadd.xlane.f32.xlu0 %v165_v16 }
  0xae   : > { %v153_v17 = vpop.xlane.xlu0 %152 }
  0xaf   : > { %168 = vst [vmem:[%s131_s15] sm:$0x7f] %v153_v17 }
  0xbd   : > { %v167_v18 = vpop.xlane.xlu0 %166 }
  0xbe   : > { %169 = vst [vmem:[%s131_s15 + $0x7] sm:$0x1] %v167_v18 }
  0xbf   : > { %364 = shalt.err (!%p361_p7)
}
  0xc0   : > { %s365_s2 = scalar_lea.hbm %s548_s27, 128  ;;  %s369_s5 = scalar_lea.hbm %s600_s1, 512 }
  0xc1   : > { %p366_p9 = scmp.ne.s32.totalorder %s548_s27, %s365_s2  ;;  %p370_p12 = scmp.lt.u32.totalorder %s548_s27, %s600_s1 }
  0xc2   : > { %p371_p13 = scmp.lt.u32.totalorder %s369_s5, %s365_s2  ;;  %p373_p1 = scmp.lt.u32.totalorder %s365_s2, %s548_s27 }
  0xc3   : > { %p367_p10 = pnand %p366_p9, %p510_p3 }
  0xc4   : > { %p372_p0 = por %p371_p13, %p370_p12 }
  0xc5   : > { %p368_p11 = pneg %p367_p10 }
  0xc6   : > { %p374_p2 = por %p373_p1, %p372_p0 }
  0xc8   : > { %p375_p4 = pnand %p374_p2, %p368_p11 }
  0xca   : > { %378 = shalt.err (!%p375_p4)
}
  0xcb   : > { %279 = dma.vmem_to_hbm [thread:$0]  (%p510_p3), %s543_s22, 128, %s548_s27, %s171_s28  }
  0xcc PF: > { %p285_p5 = scmp.ge.s32.totalorder %s445_s13, 2  ;;  %s198_s18 = sand.u32 1, %s417_s6  }
  0xcd   : > { %s199_s21 = scalar_lea.sflag [#allocation3], %s198_s18 }
  0xce   : > { %p282_p6 = pnand %p285_p5, %p519_p8 }
  0xd0   : > { %412 = dma.done.wait (!%p282_p6), %s199_s21, 128  }
  0xd1   : > { %414 = vsyncadd (!%p282_p6), %s199_s21, 4294967168  ;;  %s14_s13 = sadd.s32 1, %s445_s13   ;;  %s603_s6 = smov %s421_s7 }
  0xd2   : > { %p11_p7 = scmp.ge.s32.totalorder %s14_s13, 6   ;;  %s604_s7 = smov %s425_s8 }
  0xd3   : > { %s605_s8 = smov %s528_s24  ;;  %s606_s9 = smov %s437_s11 }
  0xd4   : > { %s607_s10 = smov %s441_s12  ;;  %s608_s11 = smov %s611_s16 }
  0xd5   : > { %s609_s12 = smov %s615_s17  ;;  %13 = sbr.rel (!%p11_p7) target bundleno = 5 (0x5), region = 59 }
  0xdc   :  { %204 = vsyncpa [#allocation3], 1 }
  0xdd   :  { %206 = vsyncpa [#allocation3 + $0x1], 1 }

</bundles_post_ra>
